<compile_context>
chip_gen: v7x
topology: tpu7x:2x2x1
jax: 0.10.0
libtpu: 0.0.40
codegen_flags: <defaults>
</compile_context>

<pallas_src>
import functools

import jax
import jax.numpy as jnp
from jax.experimental import pallas as pl
from jax.experimental.pallas import tpu as pltpu


def _round_up(a, b):
    return (a + b - 1) // b * b


def _gru_kernel(xh_ref, w_ref, b_ref, o_ref, *, hp):
    # xh_ref: (tm, K) bf16, columns = [h (padded to hp) | x (padded to ip)]
    # w_ref : (K, 4*hp) bf16, column blocks = [reset | update | x_new | h_new]
    # b_ref : (1, 4*hp) f32 fused biases
    # o_ref : (tm, hp) f32
    g = jnp.dot(xh_ref[...], w_ref[...],
                preferred_element_type=jnp.float32) + b_ref[...]

    r = jax.nn.sigmoid(g[:, 0:hp])                               # reset gate
    u = jax.nn.sigmoid(g[:, hp:2 * hp])                          # update gate
    n = jnp.tanh(g[:, 2 * hp:3 * hp] + r * g[:, 3 * hp:4 * hp])  # new gate

    h = xh_ref[:, 0:hp].astype(jnp.float32)                      # lane-aligned
    o_ref[...] = u * h + (1.0 - u) * n


@functools.partial(jax.jit, static_argnames=("tm",))
def _gru_pallas(xh, w_big, b_big, *, tm):
    Mp, K = xh.shape
    hp = w_big.shape[1] // 4
    grid = Mp // tm

    cost = pl.CostEstimate(
        flops=2 * Mp * K * 4 * hp,
        transcendentals=3 * Mp * hp,
        bytes_accessed=(xh.size * 2 + w_big.size * 2 + b_big.size * 4
                        + Mp * hp * 4),
    )

    return pl.pallas_call(
        functools.partial(_gru_kernel, hp=hp),
        out_shape=jax.ShapeDtypeStruct((Mp, hp), jnp.float32),
        grid_spec=pltpu.PrefetchScalarGridSpec(
            num_scalar_prefetch=0,
            grid=(grid,),
            in_specs=[
                pl.BlockSpec((tm, K), lambda i: (i, 0)),
                # Grid-invariant (constant index_map) => kept resident in VMEM,
                # bf16 to halve VMEM/HBM footprint.
                pl.BlockSpec((K, 4 * hp), lambda i: (0, 0)),
                pl.BlockSpec((1, 4 * hp), lambda i: (0, 0)),
            ],
            out_specs=pl.BlockSpec((tm, hp), lambda i: (i, 0)),
        ),
        compiler_params=pltpu.CompilerParams(
            dimension_semantics=("parallel",)),
        cost_estimate=cost,
    )(xh, w_big, b_big)


def gru_forward(x, hx, params, *, tm=256):
    """GRU cell forward matching the PyTorch module.

    x  : (B, N, input_size)
    hx : (B, N, hidden_size) or None (zero-init, as in the module)
    params: output of fuse_gru_params().
    returns hy : (B, N, hidden_size)  (f32)
    """
    B, N, in_size = x.shape
    hidden = params["hidden_size"]
    hp = params["hidden_pad"]
    ip = params["input_pad"]
    if hx is None:
        hx = jnp.zeros((B, N, hidden), dtype=x.dtype)

    M = B * N
    tm = min(tm, _round_up(M, 8))       # don't over-pad tiny inputs
    Mp = _round_up(M, tm)

    h2 = hx.reshape(M, hidden).astype(jnp.bfloat16)
    x2 = x.reshape(M, in_size).astype(jnp.bfloat16)
    h_pad = jnp.pad(h2, ((0, 0), (0, hp - hidden)))
    x_pad = jnp.pad(x2, ((0, 0), (0, ip - in_size)))
    xh = jnp.concatenate([h_pad, x_pad], axis=-1)
    xh = jnp.pad(xh, ((0, Mp - M), (0, 0)))

    out = _gru_pallas(xh, params["w_big"], params["b_big"], tm=tm)
    return out[:M, :hidden].reshape(B, N, hidden)


def fuse_gru_params(w_x2h, b_x2h, w_h2h, b_h2h, input_size, hidden_size):
    """Pack PyTorch-layout weights into the fused kernel layout.

    w_x2h: (3H, in), b_x2h: (3H,)  (nn.Linear: y = x @ W.T + b)
    w_h2h: (3H, H),  b_h2h: (3H,)
    """
    H = hidden_size
    hp = _round_up(H, 128)
    ip = _round_up(input_size, 128)
    K = hp + ip

    wx_r, wx_u, wx_n = w_x2h[0:H], w_x2h[H:2 * H], w_x2h[2 * H:3 * H]
    wh_r, wh_u, wh_n = w_h2h[0:H], w_h2h[H:2 * H], w_h2h[2 * H:3 * H]
    bx_r, bx_u, bx_n = b_x2h[0:H], b_x2h[H:2 * H], b_x2h[2 * H:3 * H]
    bh_r, bh_u, bh_n = b_h2h[0:H], b_h2h[H:2 * H], b_h2h[2 * H:3 * H]

    w_big = jnp.zeros((K, 4 * hp), dtype=jnp.float32)
    # reset gate: x and h contributions fused into one column block
    w_big = w_big.at[0:H, 0:H].set(wh_r.T)
    w_big = w_big.at[hp:hp + input_size, 0:H].set(wx_r.T)
    # update gate
    w_big = w_big.at[0:H, hp:hp + H].set(wh_u.T)
    w_big = w_big.at[hp:hp + input_size, hp:hp + H].set(wx_u.T)
    # new gate, x part (kept separate: reset multiplies only the h part)
    w_big = w_big.at[hp:hp + input_size, 2 * hp:2 * hp + H].set(wx_n.T)
    # new gate, h part
    w_big = w_big.at[0:H, 3 * hp:3 * hp + H].set(wh_n.T)

    b_big = jnp.zeros((1, 4 * hp), dtype=jnp.float32)
    b_big = b_big.at[0, 0:H].set(bx_r + bh_r)
    b_big = b_big.at[0, hp:hp + H].set(bx_u + bh_u)
    b_big = b_big.at[0, 2 * hp:2 * hp + H].set(bx_n)
    b_big = b_big.at[0, 3 * hp:3 * hp + H].set(bh_n)

    return dict(w_big=w_big.astype(jnp.bfloat16), b_big=b_big,
                hidden_size=H, input_size=input_size,
                hidden_pad=hp, input_pad=ip)


def init_gru_params(key, input_size, hidden_size):
    """Mirror nn.Linear shapes + the module's reset_parameters()."""
    std = 1.0 / (hidden_size ** 0.5)
    k1, k2, k3, k4 = jax.random.split(key, 4)
    w_x2h = jax.random.uniform(k1, (3 * hidden_size, input_size),
                               minval=-std, maxval=std, dtype=jnp.float32)
    b_x2h = jax.random.uniform(k2, (3 * hidden_size,),
                               minval=-std, maxval=std, dtype=jnp.float32)
    w_h2h = jax.random.uniform(k3, (3 * hidden_size, hidden_size),
                               minval=-std, maxval=std, dtype=jnp.float32)
    b_h2h = jax.random.uniform(k4, (3 * hidden_size,),
                               minval=-std, maxval=std, dtype=jnp.float32)
    return dict(w_x2h=w_x2h, b_x2h=b_x2h, w_h2h=w_h2h, b_h2h=b_h2h)


def gru_reference(x, hx, w_x2h, b_x2h, w_h2h, b_h2h):
    """Pure-JAX reference matching the PyTorch forward."""
    x_t = x @ w_x2h.T + b_x2h
    h_t = hx @ w_h2h.T + b_h2h
    x_r, x_u, x_n = jnp.split(x_t, 3, axis=-1)
    h_r, h_u, h_n = jnp.split(h_t, 3, axis=-1)
    r = jax.nn.sigmoid(x_r + h_r)
    u = jax.nn.sigmoid(x_u + h_u)
    n = jnp.tanh(x_n + r * h_n)
    return u * hx + (1.0 - u) * n


if __name__ == "__main__":
    B, N, input_size, hidden_size = 2, 16, 8, 32

    key = jax.random.PRNGKey(0)
    kp, kx, kh = jax.random.split(key, 3)
    raw = init_gru_params(kp, input_size, hidden_size)
    params = fuse_gru_params(raw["w_x2h"], raw["b_x2h"],
                             raw["w_h2h"], raw["b_h2h"],
                             input_size, hidden_size)

    x = jax.random.normal(kx, (B, N, input_size), dtype=jnp.float32)
    hx = jax.random.normal(kh, (B, N, hidden_size), dtype=jnp.float32)

    hy = gru_forward(x, hx, params, tm=256)
    hy = jax.block_until_ready(hy)

    # Reference with operands rounded to bf16 (the kernel feeds the MXU bf16
    # operands and accumulates in f32), gate math in f32.
    bf = lambda a: a.astype(jnp.bfloat16).astype(jnp.float32)
    ref = gru_reference(bf(x), bf(hx), bf(raw["w_x2h"]), raw["b_x2h"],
                        bf(raw["w_h2h"]), raw["b_h2h"])

    assert hy.shape == (B, N, hidden_size)
    err = float(jnp.max(jnp.abs(hy - ref)))
    assert jnp.allclose(hy, ref, atol=2e-3, rtol=2e-3), err

    print("KERNEL_OK")
</pallas_src>

<mosaic_0001>
module attributes {stable_mosaic.version = 11 : i64} {
  func.func @_gru_kernel(%arg0: i32, %arg1: memref<32x256xbf16, #tpu.memory_space<vmem>>, %arg2: memref<256x512xbf16, #tpu.memory_space<vmem>>, %arg3: memref<1x512xf32, #tpu.memory_space<vmem>>, %arg4: memref<32x128xf32, #tpu.memory_space<vmem>>) attributes {dimension_semantics = [#tpu.dimension_semantics<parallel>], iteration_bounds = array<i64: 1>, scalar_prefetch = 0 : i64, scratch_operands = 0 : i64, tpu.core_type = #tpu.core_type<tc>, window_params = [{transform_indices = @transform_0, window_bounds = array<i64: 32, 256>}, {pipeline_mode = #tpu.pipeline_mode<synchronous>, transform_indices = @transform_1, window_bounds = array<i64: 256, 512>}, {pipeline_mode = #tpu.pipeline_mode<synchronous>, transform_indices = @transform_2, window_bounds = array<i64: 1, 512>}, {transform_indices = @transform_3, window_bounds = array<i64: 32, 128>}]} {
    %c0 = arith.constant 0 : index
    %c0_0 = arith.constant 0 : index
    %0 = vector.load %arg1[%c0, %c0_0] : memref<32x256xbf16, #tpu.memory_space<vmem>>, vector<32x256xbf16>
    %c0_1 = arith.constant 0 : index
    %c0_2 = arith.constant 0 : index
    %1 = vector.load %arg2[%c0_1, %c0_2] : memref<256x512xbf16, #tpu.memory_space<vmem>>, vector<256x512xbf16>
    %cst = arith.constant dense<0.000000e+00> : vector<32x512xf32>
    %2 = tpu.matmul %0, %1, %cst {dimension_numbers = #tpu.dot_dimension_numbers<[1], [0], [0], [1], [0, 0, 1, 1], [], []>} : vector<32x256xbf16>, vector<256x512xbf16>, vector<32x512xf32> -> vector<32x512xf32>
    %c0_3 = arith.constant 0 : index
    %c0_4 = arith.constant 0 : index
    %3 = vector.load %arg3[%c0_3, %c0_4] : memref<1x512xf32, #tpu.memory_space<vmem>>, vector<1x512xf32>
    %4 = vector.broadcast %3 : vector<1x512xf32> to vector<32x512xf32>
    %5 = arith.addf %2, %4 : vector<32x512xf32>
    %6 = vector.extract_strided_slice %5 {offsets = [0, 0], sizes = [32, 128], strides = [1, 1]} : vector<32x512xf32> to vector<32x128xf32>
    %7 = arith.negf %6 : vector<32x128xf32>
    %8 = math.exp %7 : vector<32x128xf32>
    %cst_5 = arith.constant 1.000000e+00 : f32
    %9 = vector.broadcast %cst_5 : f32 to vector<32x128xf32>
    %10 = arith.addf %9, %8 : vector<32x128xf32>
    %11 = arith.divf %9, %10 : vector<32x128xf32>
    %12 = vector.extract_strided_slice %5 {offsets = [0, 128], sizes = [32, 128], strides = [1, 1]} : vector<32x512xf32> to vector<32x128xf32>
    %13 = arith.negf %12 : vector<32x128xf32>
    %14 = math.exp %13 : vector<32x128xf32>
    %cst_6 = arith.constant 1.000000e+00 : f32
    %15 = vector.broadcast %cst_6 : f32 to vector<32x128xf32>
    %16 = arith.addf %15, %14 : vector<32x128xf32>
    %17 = arith.divf %15, %16 : vector<32x128xf32>
    %18 = vector.extract_strided_slice %5 {offsets = [0, 256], sizes = [32, 128], strides = [1, 1]} : vector<32x512xf32> to vector<32x128xf32>
    %19 = vector.extract_strided_slice %5 {offsets = [0, 384], sizes = [32, 128], strides = [1, 1]} : vector<32x512xf32> to vector<32x128xf32>
    %20 = arith.mulf %11, %19 : vector<32x128xf32>
    %21 = arith.addf %18, %20 : vector<32x128xf32>
    %22 = math.tanh %21 : vector<32x128xf32>
    %c0_7 = arith.constant 0 : index
    %c0_8 = arith.constant 0 : index
    %23 = vector.load %arg1[%c0_7, %c0_8] : memref<32x256xbf16, #tpu.memory_space<vmem>>, vector<32x128xbf16>
    %24 = arith.extf %23 : vector<32x128xbf16> to vector<32x128xf32>
    %25 = arith.mulf %17, %24 : vector<32x128xf32>
    %cst_9 = arith.constant 1.000000e+00 : f32
    %26 = vector.broadcast %cst_9 : f32 to vector<32x128xf32>
    %27 = arith.subf %26, %17 : vector<32x128xf32>
    %28 = arith.mulf %27, %22 : vector<32x128xf32>
    %29 = arith.addf %25, %28 : vector<32x128xf32>
    %c0_10 = arith.constant 0 : index
    %c0_11 = arith.constant 0 : index
    %30 = vector.load %arg4[%c0_10, %c0_11] : memref<32x128xf32, #tpu.memory_space<vmem>>, vector<32x128xf32>
    tpu.vector_store %arg4[%c0_10, %c0_11], %29 {strides = array<i32>} : memref<32x128xf32, #tpu.memory_space<vmem>>, vector<32x128xf32>,
    return
  }
  func.func @transform_0(%arg0: i32) -> (i32, i32) {
    %c0_i32 = arith.constant 0 : i32
    %c0_i32_0 = arith.constant 0 : i32
    return %arg0, %c0_i32 : i32, i32
  }
  func.func @transform_1(%arg0: i32) -> (i32, i32) {
    %c0_i32 = arith.constant 0 : i32
    %c0_i32_0 = arith.constant 0 : i32
    %c0_i32_1 = arith.constant 0 : i32
    return %c0_i32, %c0_i32_0 : i32, i32
  }
  func.func @transform_2(%arg0: i32) -> (i32, i32) {
    %c0_i32 = arith.constant 0 : i32
    %c0_i32_0 = arith.constant 0 : i32
    %c0_i32_1 = arith.constant 0 : i32
    return %c0_i32, %c0_i32_0 : i32, i32
  }
  func.func @transform_3(%arg0: i32) -> (i32, i32) {
    %c0_i32 = arith.constant 0 : i32
    %c0_i32_0 = arith.constant 0 : i32
    return %arg0, %c0_i32 : i32, i32
  }
}

</mosaic_0001>

<bundles_post_ra>
// kernel: _gru_pallas.1
= control target key start
LH: loop header
LB: loop body
LE: loop exit
PB: predicated region body
PF: predicated region fallthrough
CT: control target
= control target key end

     0   :  { %8 = vsyncpa [#allocation3], 0  ;;  %s1054_s0 = inlined_call_operand.hbm [shape: bf16[32,256], index: 0, kind: input, shape index: {}]   ;;  %s1055_s1 = inlined_call_operand.hbm [shape: bf16[256,512], index: 1, kind: input, shape index: {}]   ;;  %s1056_s2 = inlined_call_operand.vmem [shape: f32[1,512], index: 2, kind: input, shape index: {}]   ;;  %s1057_s3 = inlined_call_operand.hbm [shape: f32[32,128], index: 3, kind: output, shape index: {}]  }
   0x1   :  { %9 = vsyncpa [#allocation6], 0 }
   0x2   :  { %10 = vsyncpa [#allocation4], 0  ;;  %s982_s12 = smov [#allocation2]   ;;  %s910_s16 = scalar_lea.hbm %s1054_s0, 512 }
   0x3   :  { %s16_s13 = sshll.u32 %s982_s12, 4  ;;  %p911_p0 = scmp.ne.s32.totalorder %s1054_s0, %s910_s16  ;;  %s17_s13 = int_to_ptr.vmem [resolvable:$true] %s16_s13 }
   0x4   :  { %p914_p1 = scmp.lt.u32.totalorder %s910_s16, %s1054_s0 }
   0x6   :  { %p916_p2 = pnand %p914_p1, %p911_p0 }
   0x8   :  { %919 = shalt.err (!%p916_p2)
}
   0x9   :  { %s920_s21 = scalar_lea.vmem %s17_s13, 512  ;;  %p925_p4 = scmp.lt.s32.totalorder %s17_s13, %s17_s13 }
   0xa   :  { %p921_p3 = scmp.ne.s32.totalorder %s17_s13, %s920_s21  ;;  %p926_p5 = scmp.lt.s32.totalorder %s920_s21, %s920_s21 }
   0xc   :  { %p927_p6 = por %p926_p5, %p925_p4 }
   0xe   :  { %p928_p7 = pnand %p927_p6, %p921_p3 }
  0x10   :  { %931 = shalt.err (!%p928_p7)
}
  0x11   :  { %s983_s22 = smov 128   ;;  %s984_s23 = smov 8  }
  0x12   :  { %22 = dma.hbm_to_vmem [thread:$0]  %s1054_s0, 512, %s17_s13, [#allocation3], %s983_s22, %s983_s22, %s984_s23  }
  0x13   :  { %s985_s26 = smov [#allocation5]   ;;  %s932_s30 = scalar_lea.hbm %s1055_s1, 8192 }
  0x14   :  { %s28_s27 = sshll.u32 %s985_s26, 4  ;;  %p933_p8 = scmp.ne.s32.totalorder %s1055_s1, %s932_s30  ;;  %s29_s27 = int_to_ptr.vmem [resolvable:$true] %s28_s27 }
  0x15   :  { %p936_p9 = scmp.lt.u32.totalorder %s932_s30, %s1055_s1 }
  0x17   :  { %p938_p10 = pnand %p936_p9, %p933_p8 }
  0x19   :  { %941 = shalt.err (!%p938_p10)
}
  0x1a   :  { %s942_s8 = scalar_lea.vmem %s29_s27, 8192  ;;  %p947_p12 = scmp.lt.s32.totalorder %s29_s27, %s29_s27 }
  0x1b   :  { %p943_p11 = scmp.ne.s32.totalorder %s29_s27, %s942_s8  ;;  %p948_p13 = scmp.lt.s32.totalorder %s942_s8, %s942_s8 }
  0x1d   :  { %p949_p0 = por %p948_p13, %p947_p12 }
  0x1f   :  { %p950_p1 = pnand %p949_p0, %p943_p11 }
  0x21   :  { %953 = shalt.err (!%p950_p1)
}
  0x22   :  { %s986_s0 = smov 256   ;;  %s987_s9 = smov 16  }
  0x23   :  { %34 = dma.hbm_to_vmem [thread:$0]  %s1055_s1, 8192, %s29_s27, [#allocation6], %s986_s0, %s986_s0, %s987_s9  }
  0x24   :  { %976 = dma.done.wait [#allocation3], 512  }
  0x25   :  { %977 = vsyncadd [#allocation3], 4294966784 }
  0x26   :  { %978 = dma.done.wait [#allocation6], 8192  }
  0x27   :  { %979 = vsyncadd [#allocation6], 4294959104  ;;  %v768_v0 = vld [vmem:[#allocation5 + $0x4] ss:$16 sps:$4 sm:$0xff]   ;;  %v770_v1 = vld [vmem:[#allocation5] ss:$16 sps:$4 sm:$0xff]  }
  0x28   :  { %473 = vmatprep.subr.bf16.mxu0 %v768_v0  ;;  %v771_v2 = vld [vmem:[#allocation5 + $0x24] ss:$16 sps:$4 sm:$0xff]   ;;  %v773_v3 = vld [vmem:[#allocation5 + $0x20] ss:$16 sps:$4 sm:$0xff]   ;;  %v786_v7 = vld [vmem:[#allocation5 + $0xc] ss:$16 sps:$4 sm:$0xff]  }
  0x29   :  { %474 = vmatpush1.bf16.msra.mxu0 %v770_v1  ;;  %v774_v4 = vld [vmem:[#allocation5 + $0x44] ss:$16 sps:$4 sm:$0xff]   ;;  %v776_v5 = vld [vmem:[#allocation5 + $0x40] ss:$16 sps:$4 sm:$0xff]   ;;  %v788_v8 = vld [vmem:[#allocation5 + $0x8] ss:$16 sps:$4 sm:$0xff]   ;;  %526 = vmatprep.subr.bf16.mxu1 %v786_v7 }
  0x2a   :  { %475 = vmatprep.subr.bf16.mxu0 %v771_v2  ;;  %v777_v6 = vld [vmem:[#allocation5 + $0x64] ss:$16 sps:$4 sm:$0xff]   ;;  %v779_v9 = vld [vmem:[#allocation5 + $0x60] ss:$16 sps:$4 sm:$0xff]   ;;  %527 = vmatpush1.bf16.msra.mxu1 %v788_v8  ;;  %v792_v10 = vld [vmem:[#allocation5 + $0x2c] ss:$16 sps:$4 sm:$0xff]  }
  0x2b   :  { %v794_v11 = vld [vmem:[#allocation5 + $0x28] ss:$16 sps:$4 sm:$0xff]   ;;  %v780_v12 = vld [vmem:[#allocation5 + $0x84] ss:$16 sps:$4 sm:$0xff]   ;;  %528 = vmatprep.subr.bf16.mxu1 %v792_v10  ;;  %v782_v13 = vld [vmem:[#allocation5 + $0x80] ss:$16 sps:$4 sm:$0xff]  }
  0x2c   :  { %v798_v14 = vld [vmem:[#allocation5 + $0x4c] ss:$16 sps:$4 sm:$0xff]   ;;  %v783_v15 = vld [vmem:[#allocation5 + $0xa4] ss:$16 sps:$4 sm:$0xff]   ;;  %v800_v16 = vld [vmem:[#allocation5 + $0x48] ss:$16 sps:$4 sm:$0xff]  }
  0x2d   :  { %476 = vmatpush1.bf16.msra.mxu0 %v773_v3  ;;  %v804_v17 = vld [vmem:[#allocation5 + $0x6c] ss:$16 sps:$4 sm:$0xff]   ;;  %v785_v18 = vld [vmem:[#allocation5 + $0xa0] ss:$16 sps:$4 sm:$0xff]   ;;  %v789_v19 = vld [vmem:[#allocation5 + $0xc4] ss:$16 sps:$4 sm:$0xff]  }
  0x2e   :  { %477 = vmatprep.subr.bf16.mxu0 %v774_v4  ;;  %529 = vmatpush1.bf16.msra.mxu1 %v794_v11  ;;  %v806_v20 = vld [vmem:[#allocation5 + $0x68] ss:$16 sps:$4 sm:$0xff]   ;;  %v810_v21 = vld [vmem:[#allocation5 + $0x8c] ss:$16 sps:$4 sm:$0xff]   ;;  %v791_v22 = vld [vmem:[#allocation5 + $0xc0] ss:$16 sps:$4 sm:$0xff]   ;;  %v113_v4 = vlaneseq }
  0x2f   :  { %530 = vmatprep.subr.bf16.mxu1 %v798_v14  ;;  %v795_v23 = vld [vmem:[#allocation5 + $0xe4] ss:$16 sps:$4 sm:$0xff]   ;;  %v812_v24 = vld [vmem:[#allocation5 + $0x88] ss:$16 sps:$4 sm:$0xff]   ;;  %v816_v25 = vld [vmem:[#allocation5 + $0xac] ss:$16 sps:$4 sm:$0xff]  }
  0x30   :  { %v797_v26 = vld [vmem:[#allocation5 + $0xe0] ss:$16 sps:$4 sm:$0xff]   ;;  %v801_v27 = vld [vmem:[#allocation5 + $0x104] ss:$16 sps:$4 sm:$0xff]   ;;  %v818_v28 = vld [vmem:[#allocation5 + $0xa8] ss:$16 sps:$4 sm:$0xff]  }
  0x31   :  { %478 = vmatpush1.bf16.msra.mxu0 %v776_v5  ;;  %v822_v29 = vld [vmem:[#allocation5 + $0xcc] ss:$16 sps:$4 sm:$0xff]   ;;  %v803_v30 = vld [vmem:[#allocation5 + $0x100] ss:$16 sps:$4 sm:$0xff]   ;;  %v807_v31 = vld [vmem:[#allocation5 + $0x124] ss:$16 sps:$4 sm:$0xff]  }
  0x32   :  { %479 = vmatprep.subr.bf16.mxu0 %v777_v6  ;;  %531 = vmatpush1.bf16.msra.mxu1 %v800_v16  ;;  %v824_v32 = vld [vmem:[#allocation5 + $0xc8] ss:$16 sps:$4 sm:$0xff]   ;;  %v828_v33 = vld [vmem:[#allocation5 + $0xec] ss:$16 sps:$4 sm:$0xff]   ;;  %v809_v34 = vld [vmem:[#allocation5 + $0x120] ss:$16 sps:$4 sm:$0xff]  }
  0x33   :  { %532 = vmatprep.subr.bf16.mxu1 %v804_v17  ;;  %v813_v35 = vld [vmem:[#allocation5 + $0x144] ss:$16 sps:$4 sm:$0xff]   ;;  %v830_v36 = vld [vmem:[#allocation5 + $0xe8] ss:$16 sps:$4 sm:$0xff]   ;;  %v834_v37 = vld [vmem:[#allocation5 + $0x10c] ss:$16 sps:$4 sm:$0xff]  }
  0x34   :  { %v850_v38 = vld [vmem:[#allocation2 + $0x4] ss:$8 sps:$4 sm:$0xff]   ;;  %v815_v39 = vld [vmem:[#allocation5 + $0x140] ss:$16 sps:$4 sm:$0xff]   ;;  %v836_v40 = vld [vmem:[#allocation5 + $0x108] ss:$16 sps:$4 sm:$0xff]  }
  0x35   :  { %480 = vmatpush1.bf16.msra.mxu0 %v779_v9  ;;  %505 = vmatprep.mubr.bf16.mxu0 %v850_v38  ;;  %v819_v41 = vld [vmem:[#allocation5 + $0x164] ss:$16 sps:$4 sm:$0xff]   ;;  %v840_v42 = vld [vmem:[#allocation5 + $0x12c] ss:$16 sps:$4 sm:$0xff]   ;;  %v821_v43 = vld [vmem:[#allocation5 + $0x160] ss:$16 sps:$4 sm:$0xff]  }
  0x36   :  { %481 = vmatprep.subr.bf16.mxu0 %v780_v12  ;;  %533 = vmatpush1.bf16.msra.mxu1 %v806_v20  ;;  %v825_v44 = vld [vmem:[#allocation5 + $0x184] ss:$16 sps:$4 sm:$0xff]   ;;  %v842_v45 = vld [vmem:[#allocation5 + $0x128] ss:$16 sps:$4 sm:$0xff]   ;;  %v846_v46 = vld [vmem:[#allocation5 + $0x14c] ss:$16 sps:$4 sm:$0xff]  }
  0x37   :  { %534 = vmatprep.subr.bf16.mxu1 %v810_v21  ;;  %558 = vmatprep.mubr.bf16.mxu1 %v850_v38  ;;  %v827_v47 = vld [vmem:[#allocation5 + $0x180] ss:$16 sps:$4 sm:$0xff]   ;;  %v851_v48 = vld [vmem:[#allocation5 + $0x148] ss:$16 sps:$4 sm:$0xff]   ;;  %v831_v49 = vld [vmem:[#allocation5 + $0x1a4] ss:$16 sps:$4 sm:$0xff]  }
  0x38   :  { %v852_v50 = vld [vmem:[#allocation5 + $0x16c] ss:$16 sps:$4 sm:$0xff]   ;;  %v833_v51 = vld [vmem:[#allocation5 + $0x1a0] ss:$16 sps:$4 sm:$0xff]   ;;  %v854_v52 = vld [vmem:[#allocation5 + $0x168] ss:$16 sps:$4 sm:$0xff]  }
  0x39   :  { %482 = vmatpush1.bf16.msra.mxu0 %v782_v13  ;;  %v837_v53 = vld [vmem:[#allocation5 + $0x1c4] ss:$16 sps:$4 sm:$0xff]   ;;  %v855_v54 = vld [vmem:[#allocation5 + $0x18c] ss:$16 sps:$4 sm:$0xff]   ;;  %v839_v55 = vld [vmem:[#allocation5 + $0x1c0] ss:$16 sps:$4 sm:$0xff]  }
  0x3a   :  { %483 = vmatprep.subr.bf16.mxu0 %v783_v15  ;;  %535 = vmatpush1.bf16.msra.mxu1 %v812_v24  ;;  %v859_v56 = vld [vmem:[#allocation5 + $0x188] ss:$16 sps:$4 sm:$0xff]   ;;  %v843_v57 = vld [vmem:[#allocation5 + $0x1e4] ss:$16 sps:$4 sm:$0xff]   ;;  %v861_v58 = vld [vmem:[#allocation5 + $0x1ac] ss:$16 sps:$4 sm:$0xff]  }
  0x3b   :  { %536 = vmatprep.subr.bf16.mxu1 %v816_v25  ;;  %v845_v59 = vld [vmem:[#allocation5 + $0x1e0] ss:$16 sps:$4 sm:$0xff]   ;;  %v863_v60 = vld [vmem:[#allocation5 + $0x1a8] ss:$16 sps:$4 sm:$0xff]   ;;  %v864_v61 = vld [vmem:[#allocation5 + $0x1cc] ss:$16 sps:$4 sm:$0xff]  }
  0x3c   :  { %v848_v62 = vld [vmem:[#allocation2] ss:$8 sps:$4 sm:$0xff]   ;;  %v857_v63 = vld [vmem:[#allocation2 + $0x14] ss:$8 sps:$4 sm:$0xff]   ;;  %v860_v3 = vld [vmem:[#allocation2 + $0x10] ss:$8 sps:$4 sm:$0xff]  }
  0x3d   :  { %484 = vmatpush1.bf16.msra.mxu0 %v785_v18  ;;  %v866_v0 = vld [vmem:[#allocation5 + $0x1c8] ss:$16 sps:$4 sm:$0xff]   ;;  %v867_v1 = vld [vmem:[#allocation5 + $0x1ec] ss:$16 sps:$4 sm:$0xff]   ;;  %v114_v5 = vshrl.u32 %v113_v4, 7 }
  0x3e   :  { %485 = vmatprep.subr.bf16.mxu0 %v789_v19  ;;  %537 = vmatpush1.bf16.msra.mxu1 %v818_v28  ;;  %v869_v2 = vld [vmem:[#allocation5 + $0x1e8] ss:$16 sps:$4 sm:$0xff]   ;;  %v111_v7 = vld [vmem:[%s1056_s2] sm:$0xf]  ;;  %s988_s2 = smov [#allocation7]  }
  0x3f   :  { %538 = vmatprep.subr.bf16.mxu1 %v822_v29  ;;  %v115_v6 = vsub.s32 0, %v114_v5  ;;  %v119_v8 = vsub.s32 1, %v114_v5  ;;  %s672_s13 = sshll.u32 %s988_s2, 4  ;;  %s673_s13 = int_to_ptr.vmem [resolvable:$true] %s672_s13 }
  0x40   :  { %s954_s14 = scalar_lea.vmem %s673_s13, 512  ;;  %p959_p3 = scmp.lt.s32.totalorder %s673_s13, %s673_s13 }
  0x41   :  { %486 = vmatpush1.bf16.msra.mxu0 %v791_v22  ;;  %v116_v9 = vrot.slane %v111_v7, %v115_v6  ;;  %v120_v11 = vrot.slane %v111_v7, %v119_v8  ;;  %p955_p2 = scmp.ne.s32.totalorder %s673_s13, %s954_s14  ;;  %p960_p4 = scmp.lt.s32.totalorder %s954_s14, %s954_s14 }
  0x42   :  { %487 = vmatprep.subr.bf16.mxu0 %v795_v23  ;;  %539 = vmatpush1.bf16.msra.mxu1 %v824_v32 }
  0x43   :  { %540 = vmatprep.subr.bf16.mxu1 %v828_v33  ;;  %p961_p5 = por %p960_p4, %p959_p3 }
  0x45   :  { %488 = vmatpush1.bf16.msra.mxu0 %v797_v26  ;;  %p962_p6 = pnand %p961_p5, %p955_p2 }
  0x46   :  { %489 = vmatprep.subr.bf16.mxu0 %v801_v27  ;;  %541 = vmatpush1.bf16.msra.mxu1 %v830_v36 }
  0x47   :  { %542 = vmatprep.subr.bf16.mxu1 %v834_v37 }
  0x49   :  { %490 = vmatpush1.bf16.msra.mxu0 %v803_v30 }
  0x4a   :  { %491 = vmatprep.subr.bf16.mxu0 %v807_v31  ;;  %543 = vmatpush1.bf16.msra.mxu1 %v836_v40 }
  0x4b   :  { %544 = vmatprep.subr.bf16.mxu1 %v840_v42  ;;  %v127_v42 = vsub.s32 3, %v114_v5 }
  0x4d   :  { %492 = vmatpush1.bf16.msra.mxu0 %v809_v34 }
  0x4e   :  { %493 = vmatprep.subr.bf16.mxu0 %v813_v35  ;;  %545 = vmatpush1.bf16.msra.mxu1 %v842_v45 }
  0x4f   :  { %546 = vmatprep.subr.bf16.mxu1 %v846_v46 }
  0x51   :  { %494 = vmatpush1.bf16.msra.mxu0 %v815_v39 }
  0x52   :  { %495 = vmatprep.subr.bf16.mxu0 %v819_v41  ;;  %547 = vmatpush1.bf16.msra.mxu1 %v851_v48  ;;  %v123_v48 = vsub.s32 2, %v114_v5 }
  0x53   :  { %548 = vmatprep.subr.bf16.mxu1 %v852_v50 }
  0x55   :  { %496 = vmatpush1.bf16.msra.mxu0 %v821_v43 }
  0x56   :  { %497 = vmatprep.subr.bf16.mxu0 %v825_v44  ;;  %549 = vmatpush1.bf16.msra.mxu1 %v854_v52 }
  0x57   :  { %550 = vmatprep.subr.bf16.mxu1 %v855_v54 }
  0x59   :  { %498 = vmatpush1.bf16.msra.mxu0 %v827_v47 }
  0x5a   :  { %499 = vmatprep.subr.bf16.mxu0 %v831_v49  ;;  %551 = vmatpush1.bf16.msra.mxu1 %v859_v56  ;;  %v128_v49 = vrot.slane %v111_v7, %v127_v42  ;;  %v124_v56 = vrot.slane %v111_v7, %v123_v48 }
  0x5b   :  { %552 = vmatprep.subr.bf16.mxu1 %v861_v58 }
  0x5d   :  { %500 = vmatpush1.bf16.msra.mxu0 %v833_v51 }
  0x5e   :  { %501 = vmatprep.subr.bf16.mxu0 %v837_v53  ;;  %553 = vmatpush1.bf16.msra.mxu1 %v863_v60 }
  0x5f   :  { %554 = vmatprep.subr.bf16.mxu1 %v864_v61 }
  0x61   :  { %502 = vmatpush1.bf16.msra.mxu0 %v839_v55 }
  0x62   :  { %503 = vmatprep.subr.bf16.mxu0 %v843_v57  ;;  %555 = vmatpush1.bf16.msra.mxu1 %v866_v0 }
  0x63   :  { %556 = vmatprep.subr.bf16.mxu1 %v867_v1 }
  0x65   :  { %504 = vmatpush1.bf16.msra.mxu0 %v845_v59 }
  0x66   :  { %557 = vmatpush1.bf16.msra.mxu1 %v869_v2 }
  0x68   :  { %506 = vmatmul.mubr.bf16.vlgmr.msra.gmra.mrb[0].mxu0 %v848_v62 }
  0x69   :  { %515 = vmatprep.mubr.bf16.mxu0 %v857_v63  ;;  %559 = vmatmul.mubr.bf16.vlgmr.msra.gmra.mrb[0].mxu1 %v848_v62 }
  0x6a   :  { %568 = vmatprep.mubr.bf16.mxu1 %v857_v63 }
  0x70   :  { %516 = vmatmul.mubr.bf16.gmra.mrb[4].mxu0 %v860_v3 }
  0x71   :  { %569 = vmatmul.mubr.bf16.gmra.mrb[4].mxu1 %v860_v3 }
 0x13b   :  { %v507_v10 = vpop.f32.mrb[0].mxu0 }
 0x13c   :  { %v508_v12 = vadd.f32 %v507_v10, %v116_v9  ;;  %v509_v13 = vpop.f32.mrb[1].mxu0  ;;  %v560_v23 = vpop.f32.mrb[0].mxu1 }
 0x13d   :  { %v511_v14 = vpop.f32.mrb[2].mxu0  ;;  %v510_v18 = vadd.f32 %v509_v13, %v120_v11  ;;  %v562_v26 = vpop.f32.mrb[1].mxu1  ;;  %v561_v62 = vadd.f32 %v560_v23, %v124_v56 }
 0x13e   :  { %v753_v15 = vmul.f32 -1.442695, %v508_v12  ;;  %v512_v16 = vadd.f32 %v511_v14, %v116_v9  ;;  %v513_v17 = vpop.f32.mrb[3].mxu0  ;;  %v564_v29 = vpop.f32.mrb[2].mxu1  ;;  %v563_v57 = vadd.f32 %v562_v26, %v128_v49  ;;  %v639_v14 = vld [vmem:[#allocation2] ss:$8 sps:$4 sm:$0xff]  }
 0x13f   :  { %v514_v20 = vadd.f32 %v513_v17, %v120_v11  ;;  %v757_v21 = vmul.f32 -1.442695, %v510_v18  ;;  %v566_v34 = vpop.f32.mrb[3].mxu1  ;;  %v565_v3 = vadd.f32 %v564_v29, %v124_v56  ;;  %v644_v23 = vunpack.c.h.bf16 %v639_v14 }
 0x140   :  { %870 = vpow2.f32 %v753_v15  ;;  %v754_v19 = vmul.f32 -1.442695, %v512_v16  ;;  %v567_v0 = vadd.f32 %v566_v34, %v128_v49 }
 0x141   :  { %v758_v27 = vmul.f32 -1.442695, %v514_v20  ;;  %v643_v20 = vunpack.c.l.bf16 %v639_v14 }
 0x142   :  { %872 = vpow2.f32 %v754_v19 }
 0x143   :  { %v517_v22 = vpop.f32.mrb[4].mxu0  ;;  %874 = vpow2.f32 %v757_v21 }
 0x144   :  { %v518_v24 = vadd.f32 %v517_v22, %v116_v9  ;;  %v519_v25 = vpop.f32.mrb[5].mxu0  ;;  %v570_v40 = vpop.f32.mrb[4].mxu1 }
 0x145   :  { %v521_v28 = vpop.f32.mrb[6].mxu0  ;;  %v520_v31 = vadd.f32 %v519_v25, %v120_v11  ;;  %v572_v43 = vpop.f32.mrb[5].mxu1 }
 0x146   :  { %v755_v30 = vmul.f32 -1.442695, %v518_v24  ;;  %v522_v32 = vadd.f32 %v521_v28, %v116_v9  ;;  %v523_v33 = vpop.f32.mrb[7].mxu0  ;;  %v574_v46 = vpop.f32.mrb[6].mxu1  ;;  %v573_v8 = vadd.f32 %v572_v43, %v128_v49 }
 0x147   :  { %v524_v36 = vadd.f32 %v523_v33, %v120_v11  ;;  %v759_v38 = vmul.f32 -1.442695, %v520_v31  ;;  %v576_v47 = vpop.f32.mrb[7].mxu1  ;;  %v571_v11 = vadd.f32 %v570_v40, %v124_v56  ;;  %v575_v18 = vadd.f32 %v574_v46, %v124_v56 }
 0x148   :  { %876 = vpow2.f32 %v755_v30  ;;  %v756_v35 = vmul.f32 -1.442695, %v522_v32  ;;  %v577_v13 = vadd.f32 %v576_v47, %v128_v49  ;;  %v641_v30 = vld [vmem:[#allocation2 + $0x10] ss:$8 sps:$4 sm:$0xff]  }
 0x149   :  { %878 = vpow2.f32 %v758_v27  ;;  %v760_v45 = vmul.f32 -1.442695, %v524_v36 }
 0x14a   :  { %v871_v37 = vpop.eup %870  ;;  %880 = vpow2.f32 %v756_v35  ;;  %v645_v35 = vunpack.c.l.bf16 %v641_v30 }
 0x14b   :  { %v591_v39 = vadd.f32 1.0, %v871_v37 }
 0x14c   :  { %v873_v41 = vpop.eup %872 }
 0x14d   :  { %882 = vrcp.f32 %v591_v39  ;;  %v592_v44 = vadd.f32 1.0, %v873_v41  ;;  %v875_v50 = vpop.eup %874 }
 0x14e   :  { %884 = vpow2.f32 %v759_v38  ;;  %v615_v55 = vadd.f32 1.0, %v875_v50  ;;  %v646_v38 = vunpack.c.h.bf16 %v641_v30 }
 0x14f   :  { %886 = vrcp.f32 %v592_v44 }
 0x150   :  { %888 = vpow2.f32 %v760_v45 }
 0x152   :  { %v877_v51 = vpop.eup %876 }
 0x153   :  { %v879_v52 = vpop.eup %878  ;;  %v593_v53 = vadd.f32 1.0, %v877_v51 }
 0x154   :  { %v881_v54 = vpop.eup %880  ;;  %v616_v59 = vadd.f32 1.0, %v879_v52 }
 0x155   :  { %890 = vrcp.f32 %v593_v53  ;;  %v594_v58 = vadd.f32 1.0, %v881_v54 }
 0x157   :  { %v883_v60 = vpop.eup %882  ;;  %892 = vrcp.f32 %v594_v58 }
 0x158   :  { %v885_v61 = vpop.eup %884  ;;  %894 = vrcp.f32 %v615_v55  ;;  %v627_v63 = vmul.f32 %v883_v60, %v563_v57 }
 0x159   :  { %v887_v1 = vpop.eup %886  ;;  %896 = vrcp.f32 %v616_v59  ;;  %v617_v6 = vadd.f32 1.0, %v885_v61 }
 0x15a   :  { %v631_v2 = vadd.f32 %v627_v63, %v561_v62  ;;  %v628_v4 = vmul.f32 %v887_v1, %v567_v0  ;;  %v889_v5 = vpop.eup %888 }
 0x15b   :  { %v618_v9 = vadd.f32 1.0, %v889_v5 }
 0x15c   :  { %898 = vtanh.f32 %v631_v2  ;;  %v632_v7 = vadd.f32 %v628_v4, %v565_v3 }
 0x15e   :  { %900 = vtanh.f32 %v632_v7 }
 0x15f   :  { %v891_v10 = vpop.eup %890  ;;  %902 = vrcp.f32 %v617_v6 }
 0x160   :  { %v629_v12 = vmul.f32 %v891_v10, %v573_v8  ;;  %904 = vrcp.f32 %v618_v9 }
 0x161   :  { %v893_v15 = vpop.eup %892 }
 0x162   :  { %v895_v16 = vpop.eup %894  ;;  %v633_v17 = vadd.f32 %v629_v12, %v571_v11  ;;  %v630_v19 = vmul.f32 %v893_v15, %v577_v13 }
 0x163   :  { %v897_v21 = vpop.eup %896  ;;  %v651_v24 = vsub.f32 1.0, %v895_v16  ;;  %v647_v26 = vmul.f32 %v895_v16, %v643_v20 }
 0x164   :  { %906 = vtanh.f32 %v633_v17  ;;  %v634_v22 = vadd.f32 %v630_v19, %v575_v18  ;;  %v652_v27 = vsub.f32 1.0, %v897_v21  ;;  %v648_v31 = vmul.f32 %v897_v21, %v644_v23 }
 0x166   :  { %v899_v25 = vpop.eup %898  ;;  %908 = vtanh.f32 %v634_v22 }
 0x167   :  { %v655_v28 = vmul.f32 %v899_v25, %v651_v24 }
 0x168   :  { %v901_v29 = vpop.eup %900 }
 0x169   :  { %v656_v32 = vmul.f32 %v901_v29, %v652_v27  ;;  %v659_v33 = vadd.f32 %v655_v28, %v647_v26  ;;  %v903_v34 = vpop.eup %902 }
 0x16a   :  { %v905_v37 = vpop.eup %904  ;;  %v653_v39 = vsub.f32 1.0, %v903_v34  ;;  %v649_v41 = vmul.f32 %v903_v34, %v645_v35 }
 0x16b   :  { %v660_v36 = vadd.f32 %v656_v32, %v648_v31  ;;  %663 = vst [vmem:[#allocation7] sm:$0xff] %v659_v33  ;;  %v654_v42 = vsub.f32 1.0, %v905_v37  ;;  %v650_v45 = vmul.f32 %v905_v37, %v646_v38 }
 0x16d   :  { %664 = vst [vmem:[#allocation7 + $0x8] sm:$0xff] %v660_v36 }
 0x16e   :  { %v907_v40 = vpop.eup %906 }
 0x16f   :  { %v657_v43 = vmul.f32 %v907_v40, %v653_v39 }
 0x170   :  { %v909_v44 = vpop.eup %908 }
 0x171   :  { %v658_v46 = vmul.f32 %v909_v44, %v654_v42  ;;  %v661_v47 = vadd.f32 %v657_v43, %v649_v41 }
 0x173   :  { %v662_v48 = vadd.f32 %v658_v46, %v650_v45  ;;  %665 = vst [vmem:[#allocation7 + $0x10] sm:$0xff] %v661_v47 }
 0x175   :  { %666 = vst [vmem:[#allocation7 + $0x18] sm:$0xff] %v662_v48 }
 0x176   :  { %965 = shalt.err (!%p962_p6)
}
 0x177   :  { %s966_s17 = scalar_lea.hbm %s1057_s3, 512 }
 0x178   :  { %p967_p7 = scmp.ne.s32.totalorder %s1057_s3, %s966_s17  ;;  %p970_p8 = scmp.lt.u32.totalorder %s966_s17, %s1057_s3 }
 0x17a   :  { %p972_p9 = pnand %p970_p8, %p967_p7 }
 0x17c   :  { %975 = shalt.err (!%p972_p9)
}
 0x17d   :  { %678 = dma.vmem_to_hbm [thread:$0]  %s673_s13, 512, %s1057_s3, [#allocation4], %s983_s22, %s983_s22, %s984_s23  }
 0x17e   :  { %980 = dma.done.wait [#allocation4], 512  }
 0x17f   :  { %981 = vsyncadd [#allocation4], 4294966784 }
 0x180   :  { %682 = vsyncpa [#allocation3], 1 }
 0x181   :  { %683 = vsyncpa [#allocation6], 1 }
 0x182   :  { %684 = vsyncpa [#allocation4], 1 }

</bundles_post_ra>
